<compile_context>
chip_gen: v6e
topology: v6e:2x2x1
jax: 0.10.0
libtpu: 0.0.40
codegen_flags: <defaults>
</compile_context>

<pallas_src>
import functools

import jax
import jax.numpy as jnp
from jax import lax
from jax.experimental import pallas as pl
from jax.experimental.pallas import tpu as pltpu


def _round_up(x, m):
    return (x + m - 1) // m * m


# ----------------------------------- kernel -----------------------------------
def _plane_mp_kernel(x_ref, src_col_ref, dst_col_ref,
                     ew_i_ref, ew_j_ref, eb_ref,
                     w1x_ref, w1a_ref, b1_ref, w2_ref, b2_ref,
                     out_ref, aggr_ref):
    """Grid = (plane, edge_tile).  One MessagePassing2D forward per plane."""
    p = pl.program_id(0)
    e = pl.program_id(1)
    n_e = pl.num_programs(1)

    @pl.when(e == 0)
    def _init():
        aggr_ref[...] = jnp.zeros_like(aggr_ref)

    x = x_ref[...]                                  # [Npad, F] f32, plane-resident
    n_pad = x.shape[0]
    te = src_col_ref.shape[0]

    # --- build one-hot selection matrices in VMEM from int32 edge indices ---
    # Padded edge slots carry index -1 and therefore produce all-zero rows.
    lane_iota = lax.broadcasted_iota(jnp.int32, (te, n_pad), 1)      # node id on lanes
    src_oh = (src_col_ref[...] == lane_iota).astype(jnp.float32)     # [Te, Npad]
    dst_oh = (dst_col_ref[...] == lane_iota).astype(jnp.float32)     # [Te, Npad]

    # --- gathers on the MXU (x stays resident in VMEM across edge tiles) ---
    x_j = jnp.dot(src_oh, x, preferred_element_type=jnp.float32)     # [Te, F]
    x_i = jnp.dot(dst_oh, x, preferred_element_type=jnp.float32)     # [Te, F]

    # --- edge gate: sigmoid(Linear(cat(x_i, x_j))) as VPU mul + lane reduce ---
    eb = eb_ref[p]                                                   # scalar (SMEM)
    logit = jnp.sum(x_i * ew_i_ref[...] + x_j * ew_j_ref[...],
                    axis=-1, keepdims=True) + eb                     # [Te, 1]
    msg = jax.nn.sigmoid(logit) * x_j                                # [Te, F]

    # --- scatter-add over target nodes into a lane-dense [F, Npad] accumulator.
    # Transposed-LHS contraction over the edge axis: dst_oh does double duty
    # (gather above + scatter here); no [Npad, Te] one-hot, no transpose.
    aggr_ref[...] += lax.dot_general(
        msg, dst_oh, dimension_numbers=(((0,), (0,)), ((), ())),
        preferred_element_type=jnp.float32)                          # [F, Npad]

    # --- node_net epilogue on the last edge tile (output block stays resident
    #     across the "arbitrary" reduction axis; its index map ignores e) ---
    @pl.when(e == n_e - 1)
    def _finalize():
        aggr = aggr_ref[...]                                         # [F, Npad]
        h1 = jnp.tanh(
            jnp.dot(x, w1x_ref[...], preferred_element_type=jnp.float32)
            + lax.dot_general(aggr, w1a_ref[...],
                              dimension_numbers=(((0,), (0,)), ((), ())),
                              preferred_element_type=jnp.float32)
            + b1_ref[...])                                           # [Npad, P]
        out = jnp.tanh(jnp.dot(h1, w2_ref[...], preferred_element_type=jnp.float32)
                       + b2_ref[...])                                # [Npad, P]
        out_ref[...] = out.astype(out_ref.dtype)


# ------------------------------ tiling heuristics -------------------------------
def _vmem_limit_bytes():
    """Scoped-VMEM limit derived from the physical VMEM of this generation."""
    try:
        cap = int(pltpu.get_tpu_info().vmem_capacity_bytes)
    except Exception:
        cap = 64 * 1024 * 1024          # conservative (v7x-sized) fallback
    # leave headroom for double buffering / compiler scratch
    return int(min(max(cap - 24 * 1024 * 1024, 32 * 1024 * 1024), 112 * 1024 * 1024))


def _pick_edge_tile(n_pad, e_max, vmem_limit, max_edge_tile):
    """Largest edge tile whose two f32 [Te, Npad] one-hots fit the VMEM budget."""
    budget = max(vmem_limit // 3, 4 * 1024 * 1024)
    te = budget // max(2 * n_pad * 4, 1)
    te = max(128, (te // 128) * 128)
    te = min(te, max_edge_tile, _round_up(e_max, 128))
    return int(te)


# ------------------------------- pallas wrapper --------------------------------
@functools.partial(jax.jit, static_argnames=("edge_tile", "vmem_limit"))
def _plane_net_call(x_all, src_col, dst_col, ew_i, ew_j, eb,
                    w1x, w1a, b1, w2, b2, *, edge_tile, vmem_limit):
    n_planes, n_pad, feat = x_all.shape
    e_pad = src_col.shape[1]
    p_out = w2.shape[-1]
    te = edge_tile
    n_edge_tiles = e_pad // te

    in_specs = [
        pl.BlockSpec((None, n_pad, feat), lambda p, e: (p, 0, 0)),       # x (resident)
        pl.BlockSpec((None, te, 1),       lambda p, e: (p, e, 0)),       # src idx (column)
        pl.BlockSpec((None, te, 1),       lambda p, e: (p, e, 0)),       # dst idx (column)
        pl.BlockSpec((None, 1, feat),     lambda p, e: (p, 0, 0)),       # edge_w (x_i half)
        pl.BlockSpec((None, 1, feat),     lambda p, e: (p, 0, 0)),       # edge_w (x_j half)
        pl.BlockSpec(memory_space=pltpu.MemorySpace.SMEM),               # edge_b [Pnum]
        pl.BlockSpec((None, feat, p_out), lambda p, e: (p, 0, 0)),       # node_w1 (x half)
        pl.BlockSpec((None, feat, p_out), lambda p, e: (p, 0, 0)),       # node_w1 (aggr half)
        pl.BlockSpec((None, 1, p_out),    lambda p, e: (p, 0, 0)),       # node_b1
        pl.BlockSpec((None, p_out, p_out), lambda p, e: (p, 0, 0)),      # node_w2
        pl.BlockSpec((None, 1, p_out),    lambda p, e: (p, 0, 0)),       # node_b2
    ]
    out_spec = pl.BlockSpec((None, n_pad, p_out), lambda p, e: (p, 0, 0))

    return pl.pallas_call(
        _plane_mp_kernel,
        out_shape=jax.ShapeDtypeStruct((n_planes, n_pad, p_out), jnp.float32),
        grid_spec=pltpu.PrefetchScalarGridSpec(
            num_scalar_prefetch=0,
            grid=(n_planes, n_edge_tiles),
            in_specs=in_specs,
            out_specs=out_spec,
            # lane-dense accumulator: nodes on lanes, features on sublanes
            scratch_shapes=[pltpu.VMEM((feat, n_pad), jnp.float32)],
        ),
        compiler_params=pltpu.CompilerParams(
            dimension_semantics=("parallel", "arbitrary"),
            vmem_limit_bytes=vmem_limit,
        ),
    )(x_all, src_col, dst_col, ew_i, ew_j, eb, w1x, w1a, b1, w2, b2)


def plane_net_forward(x_dict, edge_index_dict, params_dict, *, max_edge_tile=2048):
    """PlaneNet.forward: per-plane MessagePassing2D, fused into one pallas_call.

    Mutates x_dict in place (like the PyTorch module) and returns None.
    """
    planes = list(params_dict.keys())

    feat = x_dict[planes[0]].shape[1]
    p_out = params_dict[planes[0]]["node_b2"].shape[0]
    ns = [x_dict[p].shape[0] for p in planes]
    es = [edge_index_dict[p].shape[1] for p in planes]

    n_pad = _round_up(max(ns), 8)
    e_max = _round_up(max(max(es), 1), 128)
    vmem_limit = _vmem_limit_bytes()
    te = _pick_edge_tile(n_pad, e_max, vmem_limit, max_edge_tile)
    e_pad = _round_up(e_max, te)

    xs, src_cols, dst_cols = [], [], []
    ew_i_l, ew_j_l, eb_l = [], [], []
    w1x_l, w1a_l, b1_l, w2_l, b2_l = [], [], [], [], []

    for p in planes:
        x = x_dict[p].astype(jnp.float32)
        n = x.shape[0]
        xs.append(jnp.pad(x, ((0, n_pad - n), (0, 0))))

        ei = edge_index_dict[p].astype(jnp.int32)
        e = ei.shape[1]
        src = jnp.pad(ei[0], (0, e_pad - e), constant_values=-1)   # -1 => no-op edge
        dst = jnp.pad(ei[1], (0, e_pad - e), constant_values=-1)
        src_cols.append(src.reshape(e_pad, 1))
        dst_cols.append(dst.reshape(e_pad, 1))

        prm = params_dict[p]
        ew = prm["edge_w"].astype(jnp.float32)                     # [2F, 1]
        ew_i_l.append(ew[:feat, 0].reshape(1, feat))
        ew_j_l.append(ew[feat:, 0].reshape(1, feat))
        eb_l.append(prm["edge_b"].astype(jnp.float32).reshape(()))

        w1 = prm["node_w1"].astype(jnp.float32)                    # [2F, P]
        w1x_l.append(w1[:feat])
        w1a_l.append(w1[feat:])
        b1_l.append(prm["node_b1"].astype(jnp.float32).reshape(1, p_out))
        w2_l.append(prm["node_w2"].astype(jnp.float32))
        b2_l.append(prm["node_b2"].astype(jnp.float32).reshape(1, p_out))

    out = _plane_net_call(
        jnp.stack(xs), jnp.stack(src_cols), jnp.stack(dst_cols),
        jnp.stack(ew_i_l), jnp.stack(ew_j_l), jnp.stack(eb_l),
        jnp.stack(w1x_l), jnp.stack(w1a_l), jnp.stack(b1_l),
        jnp.stack(w2_l), jnp.stack(b2_l),
        edge_tile=te, vmem_limit=vmem_limit,
    )

    for i, p in enumerate(planes):
        x_dict[p] = out[i, :ns[i], :]
    return None  # matches the PyTorch module (mutates x dict, returns None)
    # TODO(synk): torch.utils.checkpoint is a training-memory feature with no
    # forward-pass effect; not translated.


# ----------------------- pure-JAX reference (for checking) ---------------------
def _reference_plane(x, edge_index, params):
    src, dst = edge_index[0], edge_index[1]
    x_j = x[src]
    x_i = x[dst]
    cat_ij = jnp.concatenate([x_i, x_j], axis=-1)
    gate = jax.nn.sigmoid(cat_ij @ params["edge_w"] + params["edge_b"])
    msg = gate * x_j
    aggr = jnp.zeros_like(x).at[dst].add(msg)
    h = jnp.concatenate([x, aggr], axis=-1)
    h1 = jnp.tanh(h @ params["node_w1"] + params["node_b1"])
    return jnp.tanh(h1 @ params["node_w2"] + params["node_b2"])


# ----------------------------- parameter construction ---------------------------
def make_params(key, in_features, planar_features):
    feat = in_features + planar_features
    feats = 2 * feat
    ks = jax.random.split(key, 6)
    scale = 0.2
    return {
        "edge_w": scale * jax.random.normal(ks[0], (feats, 1), jnp.float32),
        "edge_b": scale * jax.random.normal(ks[1], (1,), jnp.float32),
        "node_w1": scale * jax.random.normal(ks[2], (feats, planar_features), jnp.float32),
        "node_b1": scale * jax.random.normal(ks[3], (planar_features,), jnp.float32),
        "node_w2": scale * jax.random.normal(ks[4], (planar_features, planar_features), jnp.float32),
        "node_b2": scale * jax.random.normal(ks[5], (planar_features,), jnp.float32),
    }


if __name__ == "__main__":
    in_features = 4
    planar_features = 8
    planes = ["u", "v", "y"]
    N = 16   # nodes per plane
    E = 32   # edges per plane
    F = in_features + planar_features

    key = jax.random.PRNGKey(0)
    params_dict, x_dict, ei_dict = {}, {}, {}
    for p in planes:
        key, kp, kx, ke = jax.random.split(key, 4)
        params_dict[p] = make_params(kp, in_features, planar_features)
        x_dict[p] = jax.random.normal(kx, (N, F), jnp.float32)
        ei_dict[p] = jax.random.randint(ke, (2, E), 0, N, dtype=jnp.int32)

    # keep originals for the reference check (forward mutates x_dict)
    x_orig = {p: x_dict[p] for p in planes}

    plane_net_forward(x_dict, ei_dict, params_dict)

    ok = True
    for p in planes:
        out = jax.block_until_ready(x_dict[p])
        ref = _reference_plane(x_orig[p], ei_dict[p], params_dict[p])
        if out.shape != (N, planar_features):
            ok = False
        if not jnp.allclose(out, ref, atol=1e-4, rtol=1e-4):
            ok = False

    if ok:
        print("KERNEL_OK")
    else:
        print("MISMATCH")
</pallas_src>

<mosaic_0001>
module attributes {stable_mosaic.version = 11 : i64} {
  func.func @_plane_mp_kernel(%arg0: i32, %arg1: i32, %arg2: memref<1x16x12xf32, #tpu.memory_space<vmem>>, %arg3: memref<1x128x1xi32, #tpu.memory_space<vmem>>, %arg4: memref<1x128x1xi32, #tpu.memory_space<vmem>>, %arg5: memref<1x1x12xf32, #tpu.memory_space<vmem>>, %arg6: memref<1x1x12xf32, #tpu.memory_space<vmem>>, %arg7: memref<3xf32, #tpu.memory_space<smem>>, %arg8: memref<1x12x8xf32, #tpu.memory_space<vmem>>, %arg9: memref<1x12x8xf32, #tpu.memory_space<vmem>>, %arg10: memref<1x1x8xf32, #tpu.memory_space<vmem>>, %arg11: memref<1x8x8xf32, #tpu.memory_space<vmem>>, %arg12: memref<1x1x8xf32, #tpu.memory_space<vmem>>, %arg13: memref<1x16x8xf32, #tpu.memory_space<vmem>>, %arg14: memref<12x16xf32, #tpu.memory_space<vmem>>) attributes {dimension_semantics = [#tpu.dimension_semantics<parallel>, #tpu.dimension_semantics<arbitrary>], iteration_bounds = array<i64: 3, 1>, scalar_prefetch = 0 : i64, scratch_operands = 1 : i64, tpu.core_type = #tpu.core_type<tc>, window_params = [{transform_indices = @transform_0, window_bounds = array<i64: 1, 16, 12>}, {transform_indices = @transform_1, window_bounds = array<i64: 1, 128, 1>}, {transform_indices = @transform_2, window_bounds = array<i64: 1, 128, 1>}, {transform_indices = @transform_3, window_bounds = array<i64: 1, 1, 12>}, {transform_indices = @transform_4, window_bounds = array<i64: 1, 1, 12>}, {transform_indices = @transform_5, window_bounds = array<i64: 3>}, {transform_indices = @transform_6, window_bounds = array<i64: 1, 12, 8>}, {transform_indices = @transform_7, window_bounds = array<i64: 1, 12, 8>}, {transform_indices = @transform_8, window_bounds = array<i64: 1, 1, 8>}, {transform_indices = @transform_9, window_bounds = array<i64: 1, 8, 8>}, {transform_indices = @transform_10, window_bounds = array<i64: 1, 1, 8>}, {transform_indices = @transform_11, window_bounds = array<i64: 1, 16, 8>}]} {
    %c0_i32 = arith.constant 0 : i32
    %0 = arith.cmpi eq, %arg1, %c0_i32 : i32
    %1 = arith.extui %0 : i1 to i32
    %c0_i32_0 = arith.constant 0 : i32
    %2 = arith.cmpi ne, %1, %c0_i32_0 : i32
    scf.if %2 {
      %cst_25 = arith.constant 0.000000e+00 : f32
      %49 = vector.broadcast %cst_25 : f32 to vector<12x16xf32>
      %c0_26 = arith.constant 0 : index
      %c0_27 = arith.constant 0 : index
      %50 = vector.load %arg14[%c0_26, %c0_27] : memref<12x16xf32, #tpu.memory_space<vmem>>, vector<12x16xf32>
      tpu.vector_store %arg14[%c0_26, %c0_27], %49 {strides = array<i32>} : memref<12x16xf32, #tpu.memory_space<vmem>>, vector<12x16xf32>,
    } else {
    }
    %c0 = arith.constant 0 : index
    %c0_1 = arith.constant 0 : index
    %c0_2 = arith.constant 0 : index
    %3 = vector.load %arg2[%c0, %c0_1, %c0_2] : memref<1x16x12xf32, #tpu.memory_space<vmem>>, vector<1x16x12xf32>
    %4 = vector.shape_cast %3 : vector<1x16x12xf32> to vector<16x12xf32>
    %5 = tpu.iota {dimensions = array<i32: 1>} : vector<128x16xi32>
    %c0_3 = arith.constant 0 : index
    %c0_4 = arith.constant 0 : index
    %c0_5 = arith.constant 0 : index
    %6 = vector.load %arg3[%c0_3, %c0_4, %c0_5] : memref<1x128x1xi32, #tpu.memory_space<vmem>>, vector<1x128x1xi32>
    %7 = vector.shape_cast %6 : vector<1x128x1xi32> to vector<128x1xi32>
    %8 = vector.broadcast %7 : vector<128x1xi32> to vector<128x16xi32>
    %9 = arith.cmpi eq, %8, %5 : vector<128x16xi32>
    %10 = arith.extui %9 : vector<128x16xi1> to vector<128x16xi32>
    %11 = arith.sitofp %10 : vector<128x16xi32> to vector<128x16xf32>
    %c0_6 = arith.constant 0 : index
    %c0_7 = arith.constant 0 : index
    %c0_8 = arith.constant 0 : index
    %12 = vector.load %arg4[%c0_6, %c0_7, %c0_8] : memref<1x128x1xi32, #tpu.memory_space<vmem>>, vector<1x128x1xi32>
    %13 = vector.shape_cast %12 : vector<1x128x1xi32> to vector<128x1xi32>
    %14 = vector.broadcast %13 : vector<128x1xi32> to vector<128x16xi32>
    %15 = arith.cmpi eq, %14, %5 : vector<128x16xi32>
    %16 = arith.extui %15 : vector<128x16xi1> to vector<128x16xi32>
    %17 = arith.sitofp %16 : vector<128x16xi32> to vector<128x16xf32>
    %cst = arith.constant dense<0.000000e+00> : vector<128x12xf32>
    %18 = tpu.matmul %11, %4, %cst {dimension_numbers = #tpu.dot_dimension_numbers<[1], [0], [0], [1], [0, 0, 1, 1], [], []>} : vector<128x16xf32>, vector<16x12xf32>, vector<128x12xf32> -> vector<128x12xf32>
    %cst_9 = arith.constant dense<0.000000e+00> : vector<128x12xf32>
    %19 = tpu.matmul %17, %4, %cst_9 {dimension_numbers = #tpu.dot_dimension_numbers<[1], [0], [0], [1], [0, 0, 1, 1], [], []>} : vector<128x16xf32>, vector<16x12xf32>, vector<128x12xf32> -> vector<128x12xf32>
    %20 = arith.index_cast %arg0 : i32 to index
    %21 = memref.load %arg7[%20] : memref<3xf32, #tpu.memory_space<smem>>
    %c0_10 = arith.constant 0 : index
    %c0_11 = arith.constant 0 : index
    %c0_12 = arith.constant 0 : index
    %22 = vector.load %arg5[%c0_10, %c0_11, %c0_12] : memref<1x1x12xf32, #tpu.memory_space<vmem>>, vector<1x1x12xf32>
    %23 = vector.shape_cast %22 : vector<1x1x12xf32> to vector<1x12xf32>
    %24 = vector.broadcast %23 : vector<1x12xf32> to vector<128x12xf32>
    %25 = arith.mulf %19, %24 : vector<128x12xf32>
    %c0_13 = arith.constant 0 : index
    %c0_14 = arith.constant 0 : index
    %c0_15 = arith.constant 0 : index
    %26 = vector.load %arg6[%c0_13, %c0_14, %c0_15] : memref<1x1x12xf32, #tpu.memory_space<vmem>>, vector<1x1x12xf32>
    %27 = vector.shape_cast %26 : vector<1x1x12xf32> to vector<1x12xf32>
    %28 = vector.broadcast %27 : vector<1x12xf32> to vector<128x12xf32>
    %29 = arith.mulf %18, %28 : vector<128x12xf32>
    %30 = arith.addf %25, %29 : vector<128x12xf32>
    %cst_16 = arith.constant dense<0.000000e+00> : vector<128xf32>
    %31 = vector.multi_reduction <add>, %30, %cst_16 [1] : vector<128x12xf32> to vector<128xf32>
    %32 = vector.shape_cast %31 : vector<128xf32> to vector<128x1xf32>
    %33 = vector.broadcast %21 : f32 to vector<128x1xf32>
    %34 = arith.addf %32, %33 : vector<128x1xf32>
    %35 = arith.negf %34 : vector<128x1xf32>
    %36 = math.exp %35 : vector<128x1xf32>
    %cst_17 = arith.constant 1.000000e+00 : f32
    %37 = vector.broadcast %cst_17 : f32 to vector<128x1xf32>
    %38 = arith.addf %37, %36 : vector<128x1xf32>
    %39 = arith.divf %37, %38 : vector<128x1xf32>
    %40 = vector.broadcast %39 : vector<128x1xf32> to vector<128x12xf32>
    %41 = arith.mulf %40, %18 : vector<128x12xf32>
    %c0_18 = arith.constant 0 : index
    %c0_19 = arith.constant 0 : index
    %42 = vector.load %arg14[%c0_18, %c0_19] : memref<12x16xf32, #tpu.memory_space<vmem>>, vector<12x16xf32>
    %cst_20 = arith.constant dense<0.000000e+00> : vector<12x16xf32>
    %43 = tpu.matmul %41, %17, %cst_20 {dimension_numbers = #tpu.dot_dimension_numbers<[0], [0], [1], [1], [0, 1, 1, 1], [], []>} : vector<128x12xf32>, vector<128x16xf32>, vector<12x16xf32> -> vector<12x16xf32>
    %44 = arith.addf %42, %43 : vector<12x16xf32>
    %c0_21 = arith.constant 0 : index
    %c0_22 = arith.constant 0 : index
    %45 = vector.load %arg14[%c0_21, %c0_22] : memref<12x16xf32, #tpu.memory_space<vmem>>, vector<12x16xf32>
    tpu.vector_store %arg14[%c0_21, %c0_22], %44 {strides = array<i32>} : memref<12x16xf32, #tpu.memory_space<vmem>>, vector<12x16xf32>,
    %c0_i32_23 = arith.constant 0 : i32
    %46 = arith.cmpi eq, %arg1, %c0_i32_23 : i32
    %47 = arith.extui %46 : i1 to i32
    %c0_i32_24 = arith.constant 0 : i32
    %48 = arith.cmpi ne, %47, %c0_i32_24 : i32
    scf.if %48 {
      %c0_25 = arith.constant 0 : index
      %c0_26 = arith.constant 0 : index
      %49 = vector.load %arg14[%c0_25, %c0_26] : memref<12x16xf32, #tpu.memory_space<vmem>>, vector<12x16xf32>
      %c0_27 = arith.constant 0 : index
      %c0_28 = arith.constant 0 : index
      %c0_29 = arith.constant 0 : index
      %50 = vector.load %arg8[%c0_27, %c0_28, %c0_29] : memref<1x12x8xf32, #tpu.memory_space<vmem>>, vector<1x12x8xf32>
      %51 = vector.shape_cast %50 : vector<1x12x8xf32> to vector<12x8xf32>
      %cst_30 = arith.constant dense<0.000000e+00> : vector<16x8xf32>
      %52 = tpu.matmul %4, %51, %cst_30 {dimension_numbers = #tpu.dot_dimension_numbers<[1], [0], [0], [1], [0, 0, 1, 1], [], []>} : vector<16x12xf32>, vector<12x8xf32>, vector<16x8xf32> -> vector<16x8xf32>
      %c0_31 = arith.constant 0 : index
      %c0_32 = arith.constant 0 : index
      %c0_33 = arith.constant 0 : index
      %53 = vector.load %arg9[%c0_31, %c0_32, %c0_33] : memref<1x12x8xf32, #tpu.memory_space<vmem>>, vector<1x12x8xf32>
      %54 = vector.shape_cast %53 : vector<1x12x8xf32> to vector<12x8xf32>
      %cst_34 = arith.constant dense<0.000000e+00> : vector<16x8xf32>
      %55 = tpu.matmul %49, %54, %cst_34 {dimension_numbers = #tpu.dot_dimension_numbers<[0], [0], [1], [1], [0, 1, 1, 1], [], []>} : vector<12x16xf32>, vector<12x8xf32>, vector<16x8xf32> -> vector<16x8xf32>
      %56 = arith.addf %52, %55 : vector<16x8xf32>
      %c0_35 = arith.constant 0 : index
      %c0_36 = arith.constant 0 : index
      %c0_37 = arith.constant 0 : index
      %57 = vector.load %arg10[%c0_35, %c0_36, %c0_37] : memref<1x1x8xf32, #tpu.memory_space<vmem>>, vector<1x1x8xf32>
      %58 = vector.shape_cast %57 : vector<1x1x8xf32> to vector<1x8xf32>
      %59 = vector.broadcast %58 : vector<1x8xf32> to vector<16x8xf32>
      %60 = arith.addf %56, %59 : vector<16x8xf32>
      %61 = math.tanh %60 : vector<16x8xf32>
      %c0_38 = arith.constant 0 : index
      %c0_39 = arith.constant 0 : index
      %c0_40 = arith.constant 0 : index
      %62 = vector.load %arg11[%c0_38, %c0_39, %c0_40] : memref<1x8x8xf32, #tpu.memory_space<vmem>>, vector<1x8x8xf32>
      %63 = vector.shape_cast %62 : vector<1x8x8xf32> to vector<8x8xf32>
      %cst_41 = arith.constant dense<0.000000e+00> : vector<16x8xf32>
      %64 = tpu.matmul %61, %63, %cst_41 {dimension_numbers = #tpu.dot_dimension_numbers<[1], [0], [0], [1], [0, 0, 1, 1], [], []>} : vector<16x8xf32>, vector<8x8xf32>, vector<16x8xf32> -> vector<16x8xf32>
      %c0_42 = arith.constant 0 : index
      %c0_43 = arith.constant 0 : index
      %c0_44 = arith.constant 0 : index
      %65 = vector.load %arg12[%c0_42, %c0_43, %c0_44] : memref<1x1x8xf32, #tpu.memory_space<vmem>>, vector<1x1x8xf32>
      %66 = vector.shape_cast %65 : vector<1x1x8xf32> to vector<1x8xf32>
      %67 = vector.broadcast %66 : vector<1x8xf32> to vector<16x8xf32>
      %68 = arith.addf %64, %67 : vector<16x8xf32>
      %69 = math.tanh %68 : vector<16x8xf32>
      %c0_45 = arith.constant 0 : index
      %c0_46 = arith.constant 0 : index
      %c0_47 = arith.constant 0 : index
      %70 = vector.load %arg13[%c0_45, %c0_46, %c0_47] : memref<1x16x8xf32, #tpu.memory_space<vmem>>, vector<1x16x8xf32>
      %71 = vector.shape_cast %70 : vector<1x16x8xf32> to vector<16x8xf32>
      %72 = vector.shape_cast %69 : vector<16x8xf32> to vector<1x16x8xf32>
      tpu.vector_store %arg13[%c0_45, %c0_46, %c0_47], %72 {strides = array<i32>} : memref<1x16x8xf32, #tpu.memory_space<vmem>>, vector<1x16x8xf32>,
    } else {
    }
    return
  }
  func.func @transform_0(%arg0: i32, %arg1: i32) -> (i32, i32, i32) {
    %c0_i32 = arith.constant 0 : i32
    %c0_i32_0 = arith.constant 0 : i32
    %c0_i32_1 = arith.constant 0 : i32
    return %arg0, %c0_i32, %c0_i32_0 : i32, i32, i32
  }
  func.func @transform_1(%arg0: i32, %arg1: i32) -> (i32, i32, i32) {
    %c0_i32 = arith.constant 0 : i32
    %c0_i32_0 = arith.constant 0 : i32
    return %arg0, %arg1, %c0_i32 : i32, i32, i32
  }
  func.func @transform_2(%arg0: i32, %arg1: i32) -> (i32, i32, i32) {
    %c0_i32 = arith.constant 0 : i32
    %c0_i32_0 = arith.constant 0 : i32
    return %arg0, %arg1, %c0_i32 : i32, i32, i32
  }
  func.func @transform_3(%arg0: i32, %arg1: i32) -> (i32, i32, i32) {
    %c0_i32 = arith.constant 0 : i32
    %c0_i32_0 = arith.constant 0 : i32
    %c0_i32_1 = arith.constant 0 : i32
    return %arg0, %c0_i32, %c0_i32_0 : i32, i32, i32
  }
  func.func @transform_4(%arg0: i32, %arg1: i32) -> (i32, i32, i32) {
    %c0_i32 = arith.constant 0 : i32
    %c0_i32_0 = arith.constant 0 : i32
    %c0_i32_1 = arith.constant 0 : i32
    return %arg0, %c0_i32, %c0_i32_0 : i32, i32, i32
  }
  func.func @transform_5(%arg0: i32, %arg1: i32) -> i32 {
    %c0_i32 = arith.constant 0 : i32
    %c0_i32_0 = arith.constant 0 : i32
    return %c0_i32 : i32
  }
  func.func @transform_6(%arg0: i32, %arg1: i32) -> (i32, i32, i32) {
    %c0_i32 = arith.constant 0 : i32
    %c0_i32_0 = arith.constant 0 : i32
    %c0_i32_1 = arith.constant 0 : i32
    return %arg0, %c0_i32, %c0_i32_0 : i32, i32, i32
  }
  func.func @transform_7(%arg0: i32, %arg1: i32) -> (i32, i32, i32) {
    %c0_i32 = arith.constant 0 : i32
    %c0_i32_0 = arith.constant 0 : i32
    %c0_i32_1 = arith.constant 0 : i32
    return %arg0, %c0_i32, %c0_i32_0 : i32, i32, i32
  }
  func.func @transform_8(%arg0: i32, %arg1: i32) -> (i32, i32, i32) {
    %c0_i32 = arith.constant 0 : i32
    %c0_i32_0 = arith.constant 0 : i32
    %c0_i32_1 = arith.constant 0 : i32
    return %arg0, %c0_i32, %c0_i32_0 : i32, i32, i32
  }
  func.func @transform_9(%arg0: i32, %arg1: i32) -> (i32, i32, i32) {
    %c0_i32 = arith.constant 0 : i32
    %c0_i32_0 = arith.constant 0 : i32
    %c0_i32_1 = arith.constant 0 : i32
    return %arg0, %c0_i32, %c0_i32_0 : i32, i32, i32
  }
  func.func @transform_10(%arg0: i32, %arg1: i32) -> (i32, i32, i32) {
    %c0_i32 = arith.constant 0 : i32
    %c0_i32_0 = arith.constant 0 : i32
    %c0_i32_1 = arith.constant 0 : i32
    return %arg0, %c0_i32, %c0_i32_0 : i32, i32, i32
  }
  func.func @transform_11(%arg0: i32, %arg1: i32) -> (i32, i32, i32) {
    %c0_i32 = arith.constant 0 : i32
    %c0_i32_0 = arith.constant 0 : i32
    %c0_i32_1 = arith.constant 0 : i32
    return %arg0, %c0_i32, %c0_i32_0 : i32, i32, i32
  }
}

</mosaic_0001>

<bundles_post_ra>
// kernel: _plane_net_call.1
= control target key start
LH: loop header
LB: loop body
LE: loop exit
PB: predicated region body
PF: predicated region fallthrough
CT: control target
= control target key end

     0   :  { %16 = vsyncpa [#allocation4], 0  ;;  %s2606_s17 = smov 0   ;;  %s2608_s18 = smov 0   ;;  %s3152_s0 = inlined_call_operand.vmem [shape: f32[3,16,12], index: 0, kind: input, shape index: {}]   ;;  %s3153_s1 = inlined_call_operand.vmem [shape: s32[3,128,1], index: 1, kind: input, shape index: {}]   ;;  %s3154_s2 = inlined_call_operand.vmem [shape: s32[3,128,1], index: 2, kind: input, shape index: {}]   ;;  %s3155_s3 = inlined_call_operand.vmem [shape: f32[3,1,12], index: 3, kind: input, shape index: {}]   ;;  %s3156_s4 = inlined_call_operand.vmem [shape: f32[3,1,12], index: 4, kind: input, shape index: {}]   ;;  %s3157_s5 = inlined_call_operand.vmem [shape: f32[3], index: 5, kind: input, shape index: {}]   ;;  %s3158_s6 = inlined_call_operand.vmem [shape: f32[3,12,8], index: 6, kind: input, shape index: {}]   ;;  %s3159_s7 = inlined_call_operand.vmem [shape: f32[3,12,8], index: 7, kind: input, shape index: {}]   ;;  %s3160_s8 = inlined_call_operand.vmem [shape: f32[3,1,8], index: 8, kind: input, shape index: {}]   ;;  %s3161_s9 = inlined_call_operand.vmem [shape: f32[3,8,8], index: 9, kind: input, shape index: {}]   ;;  %s3162_s10 = inlined_call_operand.vmem [shape: f32[3,1,8], index: 10, kind: input, shape index: {}]   ;;  %s3163_s11 = inlined_call_operand.vmem [shape: f32[3,16,8], index: 11, kind: output, shape index: {}]  }
   0x1   :  { %s2610_s19 = smov 0  }
   0x2 LB: > { %s2075_s20 = sadd.s32 4294967295, %s2540_s19   ;;  %s34_s21 = sadd.s32 1, %s2536_s18  ;;  %s2540_s19 = sphi %s2610_s19, %s22_s19   ;;  %s2536_s18 = sphi %s2608_s18, %s3176_s18   ;;  %s2532_s17 = sphi %s2606_s17, %s3175_s17  }
   0x3   : > { %p36_p0 = scmp.ge.s32.totalorder %s34_s21, 3  ;;  %p2077_p1 = scmp.ge.s32.totalorder %s2540_s19, 1 }
   0x4   : > { %p350_p2 = scmp.lt.s32.totalorder %s2540_s19, 4  ;;  %p2631_p4 = scmp.eq.s32.totalorder %s2075_s20, 0 }
   0x5   : > { %s3178_s21 = smov (%p36_p0, %s34_s21), 0  ;;  %s363_s26 = sshll.u32 %s3157_s5, 4  ;;  %s364_s26 = int_to_ptr.vmem [resolvable:$true] %s363_s26 }
   0x6   : > { %p2627_p3 = pnand %p2077_p1, %p350_p2  ;;  %s2499_s27 = scalar_lea.vmem %s364_s26, 16 }
   0x7   : > { %p2500_p7 = scmp.ne.s32.totalorder %s364_s26, %s2499_s27  ;;  %p2507_p11 = scmp.lt.s32.totalorder %s364_s26, %s364_s26 }
   0x8   : > { %p2390_p5 = pneg %p2627_p3  ;;  %p2508_p12 = scmp.lt.s32.totalorder %s2499_s27, %s2499_s27 }
   0xa   : > { %p2391_p6 = pnand %p2631_p4, %p2390_p5  ;;  %p2509_p13 = por %p2508_p12, %p2507_p11 }
   0xc   : > { %p2501_p8 = pneg %p2391_p6 }
   0xe   : > { %p2502_p9 = pnand %p2501_p8, %p2500_p7 }
  0x10   : > { %p2503_p10 = pneg %p2502_p9 }
  0x12   : > { %p2510_p0 = pnand %p2509_p13, %p2503_p10 }
  0x14   : > { %2513 = shalt.err (!%p2510_p0)
}
  0x15   : > { %s2542_s28 = smov [#allocation3]   ;;  %457 = sbr.rel (%p2627_p3) target bundleno = 1431 (0x597), region = 64 }
  0x16   : > { %2393 = dma.vmem_to_smem (!%p2391_p6), %s364_s26, 16, %s2542_s28, [#allocation4]  }
  0x1a   : > { %2527 = dma.done.wait (%p2631_p4), [#allocation4], 16  }
  0x1b   : > { %2529 = vsyncadd (%p2631_p4), [#allocation4], 4294967280 }
  0x1c   : > { %463 = sfence }
  0x1d   : > { %p542_p1 = scmp.lt.s32.totalorder %s2532_s17, 2  ;;  %v2543_v0 = vmov 0   ;;  %vm602_vm0 = vcmask 130048   ;;  %v2544_v1 = vmov 0.0   ;;  %v608_v36 = vlaneseq }
  0x1e   : > { %2425 = vset.pattern.permute.xlu1 %v2543_v0  ;;  %2424 = vset.pattern.permute.xlu0 %v2543_v0  ;;  %603 = vst.msk [vmem:[#allocation2] sm:$0xff] %vm602_vm0, %v2544_v1 }
  0x1f   : > { %s2650_s29 = scalar_select %p542_p1, %s2532_s17, 2  ;;  %v2714_v37 = vand.u32 127, %v608_v36 }
  0x21   : > { %s2206_s30 = sshll.u32 %s2650_s29, 7  ;;  %s2670_s22 = sshll.u32 %s2650_s29, 4 }
  0x22   : > { %s2656_s14 = scalar_lea.vmem %s3153_s1, %s2206_s30  ;;  %s2661_s20 = scalar_lea.vmem %s3154_s2, %s2206_s30 }
  0x23   : > { %v611_v2 = vld [vmem:[%s2656_s14 + $0x8] sm:$0xff]  ;;  %v610_v3 = vld [vmem:[%s2656_s14] sm:$0xff]  ;;  %v724_v6 = vld [vmem:[%s2661_s20 + $0x10] sm:$0xff]  ;;  %s2678_s25 = scalar_lea.vmem %s3152_s0, %s2670_s22  ;;  %s572_s28 = scalar_lea.vmem %s3156_s4, %s2650_s29 }
  0x24   : > { %630 = vperm.xlu1 %2425, %v611_v2   ;;  %627 = vperm.xlu0 %2424, %v610_v3   ;;  %v723_v4 = vld [vmem:[%s2661_s20 + $0x8] sm:$0xff]  ;;  %v722_v5 = vld [vmem:[%s2661_s20] sm:$0xff]  ;;  %v612_v7 = vld [vmem:[%s2656_s14 + $0x10] sm:$0xff]  ;;  %s569_s13 = scalar_lea.vmem %s3155_s3, %s2650_s29  ;;  %s582_s16 = scalar_lea.vmem %s3159_s7, %s2670_s22 }
  0x25   : > { %v725_v8 = vld [vmem:[%s2661_s20 + $0x18] sm:$0xff]  ;;  %v607_v10 = vld [vmem:[%s2678_s25 + $0x8] sm:$0xff]  ;;  %v2684_v11 = vld [vmem:[%s2678_s25] sm:$0xff]  ;;  %s577_s24 = scalar_lea.vmem %s3158_s6, %s2670_s22  ;;  %s2092_s26 = sshll.u32 %s2650_s29, 3 }
  0x26   : > { %v613_v9 = vld [vmem:[%s2656_s14 + $0x18] sm:$0xff]  ;;  %2276 = vmatprep.subr.mxu0 %v607_v10  ;;  %2304 = vmatprep.subr.mxu1 %v607_v10  ;;  %v726_v12 = vld [vmem:[%s2661_s20 + $0x20] sm:$0xff]  ;;  %v727_v14 = vld [vmem:[%s2661_s20 + $0x28] sm:$0xff]  ;;  %s589_s30 = scalar_lea.vmem %s3161_s9, %s2092_s26  ;;  %s592_s15 = scalar_lea.vmem %s3162_s10, %s2650_s29 }
  0x27   : > { %2277 = vmatpush3.msra.mxu0 %v607_v10  ;;  %2305 = vmatpush3.msra.mxu1 %v607_v10  ;;  %v614_v13 = vld [vmem:[%s2656_s14 + $0x20] sm:$0xff]  ;;  %v615_v15 = vld [vmem:[%s2656_s14 + $0x28] sm:$0xff]  ;;  %v728_v16 = vld [vmem:[%s2661_s20 + $0x30] sm:$0xff]  ;;  %s597_s23 = scalar_lea.vmem %s3163_s11, %s2670_s22 }
  0x28   : > { %742 = vperm.xlu1 %2425, %v723_v4   ;;  %739 = vperm.xlu0 %2424, %v722_v5   ;;  %v616_v17 = vld [vmem:[%s2656_s14 + $0x30] sm:$0xff]  ;;  %v729_v18 = vld [vmem:[%s2661_s20 + $0x38] sm:$0xff]  ;;  %v730_v20 = vld [vmem:[%s2661_s20 + $0x40] sm:$0xff] }
  0x29   : > { %2278 = vmatprep.subr.mxu0 %v2684_v11  ;;  %2306 = vmatprep.subr.mxu1 %v2684_v11  ;;  %v617_v19 = vld [vmem:[%s2656_s14 + $0x38] sm:$0xff]  ;;  %v618_v21 = vld [vmem:[%s2656_s14 + $0x40] sm:$0xff]  ;;  %v731_v22 = vld [vmem:[%s2661_s20 + $0x48] sm:$0xff] }
  0x2a   : > { %2279 = vmatpush3.msra.mxu0 %v2684_v11  ;;  %2307 = vmatpush3.msra.mxu1 %v2684_v11  ;;  %v619_v23 = vld [vmem:[%s2656_s14 + $0x48] sm:$0xff]  ;;  %v732_v24 = vld [vmem:[%s2661_s20 + $0x50] sm:$0xff]  ;;  %v733_v26 = vld [vmem:[%s2661_s20 + $0x58] sm:$0xff] }
  0x2b   : > { %v620_v25 = vld [vmem:[%s2656_s14 + $0x50] sm:$0xff]  ;;  %v621_v27 = vld [vmem:[%s2656_s14 + $0x58] sm:$0xff]  ;;  %v734_v28 = vld [vmem:[%s2661_s20 + $0x60] sm:$0xff] }
  0x2c   : > { %745 = vperm.xlu1 %2425, %v724_v6   ;;  %633 = vperm.xlu0 %2424, %v612_v7   ;;  %v622_v29 = vld [vmem:[%s2656_s14 + $0x60] sm:$0xff]  ;;  %v735_v30 = vld [vmem:[%s2661_s20 + $0x68] sm:$0xff]  ;;  %v736_v32 = vld [vmem:[%s2661_s20 + $0x70] sm:$0xff] }
  0x2d   : > { %v623_v31 = vld [vmem:[%s2656_s14 + $0x68] sm:$0xff]  ;;  %v624_v33 = vld [vmem:[%s2656_s14 + $0x70] sm:$0xff]  ;;  %v737_v34 = vld [vmem:[%s2661_s20 + $0x78] sm:$0xff] }
  0x2e   : > { %v625_v35 = vld [vmem:[%s2656_s14 + $0x78] sm:$0xff]  ;;  %s1221_s14 = sld [smem:[#allocation3 + %s2532_s17]] }
  0x30   : > { %748 = vperm.xlu1 %2425, %v725_v8   ;;  %636 = vperm.xlu0 %2424, %v613_v9  }
  0x34   : > { %751 = vperm.xlu1 %2425, %v726_v12   ;;  %639 = vperm.xlu0 %2424, %v614_v13  }
  0x38   : > { %754 = vperm.xlu1 %2425, %v727_v14   ;;  %642 = vperm.xlu0 %2424, %v615_v15  }
  0x3c   : > { %757 = vperm.xlu1 %2425, %v728_v16   ;;  %645 = vperm.xlu0 %2424, %v616_v17  }
  0x40   : > { %760 = vperm.xlu1 %2425, %v729_v18   ;;  %648 = vperm.xlu0 %2424, %v617_v19  }
  0x44   : > { %763 = vperm.xlu1 %2425, %v730_v20   ;;  %651 = vperm.xlu0 %2424, %v618_v21  }
  0x48   : > { %766 = vperm.xlu1 %2425, %v731_v22   ;;  %654 = vperm.xlu0 %2424, %v619_v23  }
  0x4c   : > { %769 = vperm.xlu1 %2425, %v732_v24   ;;  %657 = vperm.xlu0 %2424, %v620_v25  }
  0x50   : > { %772 = vperm.xlu1 %2425, %v733_v26   ;;  %660 = vperm.xlu0 %2424, %v621_v27  }
  0x54   : > { %775 = vperm.xlu1 %2425, %v734_v28   ;;  %663 = vperm.xlu0 %2424, %v622_v29  }
  0x58   : > { %778 = vperm.xlu1 %2425, %v735_v30   ;;  %666 = vperm.xlu0 %2424, %v623_v31  }
  0x5c   : > { %781 = vperm.xlu1 %2425, %v736_v32   ;;  %669 = vperm.xlu0 %2424, %v624_v33  }
  0x60   : > { %784 = vperm.xlu1 %2425, %v737_v34   ;;  %672 = vperm.xlu0 %2424, %v625_v35  }
  0x9f   : > { %v631_v38 = vpop.permute.xlu1 %630  ;;  %v628_v39 = vpop.permute.xlu0 %627 }
  0xa0   : > { %vm675_vm1 = vcmp.eq.s32.totalorder %v631_v38, %v2714_v37  ;;  %vm674_vm2 = vcmp.eq.s32.totalorder %v628_v39, %v2714_v37 }
  0xa1   : > { %v2096_v40 = vsel %vm675_vm1, 1.0, %v2544_v1  ;;  %v2095_v41 = vsel %vm674_vm2, 1.0, %v2544_v1 }
  0xa2   : > { %2280 = vmatprep.mubr.msk.f32.mxu0 %vm602_vm0, %v2095_v41  ;;  %v2545_v41 = vmov 1.0  }
  0xa3   : > { %v2721_v42 = vpop.permute.xlu1 %742  ;;  %v2723_v43 = vpop.permute.xlu0 %739  ;;  %2281 = vmatmul.mubr.msk.f32.vlgmr.msra.gmra.mxu0 %vm602_vm0, %v2096_v40 }
  0xa4   : > { %vm3165_vm3 = vcmp.eq.s32.totalorder %v2721_v42, %v2714_v37  ;;  %vm3164_vm4 = vcmp.eq.s32.totalorder %v2723_v43, %v2714_v37 }
  0xa5   : > { %v2112_v44 = vsel %vm3165_vm3, 1.0, %v2544_v1  ;;  %v2111_v45 = vsel %vm3164_vm4, 1.0, %v2544_v1 }
  0xa6   : > { %2308 = vmatprep.mubr.msk.f32.mxu1 %vm602_vm0, %v2111_v45  ;;  %v2974_v45 = vld [vmem:[%s569_s13] ss:$0 sm:$0xff]  ;;  %s585_s13 = scalar_lea.vmem %s3160_s8, %s2650_s29 }
  0xa7   : > { %v2739_v46 = vpop.permute.xlu1 %745  ;;  %v634_v47 = vpop.permute.xlu0 %633  ;;  %2309 = vmatmul.mubr.msk.f32.vlgmr.msra.gmra.mxu1 %vm602_vm0, %v2112_v44 }
  0xa8   : > { %vm3166_vm5 = vcmp.eq.s32.totalorder %v2739_v46, %v2714_v37  ;;  %vm676_vm6 = vcmp.eq.s32.totalorder %v634_v47, %v2714_v37 }
  0xa9   : > { %v2113_v48 = vsel %vm3166_vm5, 1.0, %v2544_v1  ;;  %v2097_v49 = vsel %vm676_vm6, 1.0, %v2544_v1 }
  0xaa   : > { %2283 = vmatprep.mubr.msk.f32.mxu0 %vm602_vm0, %v2097_v49  ;;  %2311 = vmatprep.mubr.msk.f32.mxu1 %vm602_vm0, %v2113_v48 }
  0xab   : > { %v2752_v50 = vpop.permute.xlu1 %748  ;;  %v637_v51 = vpop.permute.xlu0 %636 }
  0xac   : > { %vm789_vm7 = vcmp.eq.s32.totalorder %v2752_v50, %v2714_v37  ;;  %vm677_vm8 = vcmp.eq.s32.totalorder %v637_v51, %v2714_v37 }
  0xad   : > { %v2114_v52 = vsel %vm789_vm7, 1.0, %v2544_v1  ;;  %v2098_v53 = vsel %vm677_vm8, 1.0, %v2544_v1 }
  0xae   : > { %2284 = vmatmul.mubr.msk.f32.gmra.mxu0 %vm602_vm0, %v2098_v53  ;;  %2312 = vmatmul.mubr.msk.f32.gmra.mxu1 %vm602_vm0, %v2114_v52 }
  0xaf   : > { %v2764_v54 = vpop.permute.xlu1 %751  ;;  %v640_v55 = vpop.permute.xlu0 %639 }
  0xb0   : > { %vm790_vm9 = vcmp.eq.s32.totalorder %v2764_v54, %v2714_v37  ;;  %vm678_vm10 = vcmp.eq.s32.totalorder %v640_v55, %v2714_v37 }
  0xb1   : > { %v2115_v56 = vsel %vm790_vm9, 1.0, %v2544_v1  ;;  %v2099_v57 = vsel %vm678_vm10, 1.0, %v2544_v1 }
  0xb2   : > { %2286 = vmatprep.mubr.msk.f32.mxu0 %vm602_vm0, %v2099_v57  ;;  %2314 = vmatprep.mubr.msk.f32.mxu1 %vm602_vm0, %v2115_v56 }
  0xb3   : > { %v2776_v58 = vpop.permute.xlu1 %754  ;;  %v643_v59 = vpop.permute.xlu0 %642 }
  0xb4   : > { %vm791_vm11 = vcmp.eq.s32.totalorder %v2776_v58, %v2714_v37  ;;  %vm679_vm12 = vcmp.eq.s32.totalorder %v643_v59, %v2714_v37 }
  0xb5   : > { %v2116_v60 = vsel %vm791_vm11, 1.0, %v2544_v1  ;;  %v2100_v61 = vsel %vm679_vm12, 1.0, %v2544_v1 }
  0xb6   : > { %2287 = vmatmul.mubr.msk.f32.gmra.mxu0 %vm602_vm0, %v2100_v61  ;;  %2315 = vmatmul.mubr.msk.f32.gmra.mxu1 %vm602_vm0, %v2116_v60 }
  0xb7   : > { %v2788_v62 = vpop.permute.xlu1 %757  ;;  %v646_v63 = vpop.permute.xlu0 %645 }
  0xb8   : > { %vm792_vm13 = vcmp.eq.s32.totalorder %v2788_v62, %v2714_v37  ;;  %vm680_vm14 = vcmp.eq.s32.totalorder %v646_v63, %v2714_v37 }
  0xb9   : > { %v2117_v0 = vsel %vm792_vm13, 1.0, %v2544_v1  ;;  %v2101_v2 = vsel %vm680_vm14, 1.0, %v2544_v1 }
  0xba   : > { %2289 = vmatprep.mubr.msk.f32.mxu0 %vm602_vm0, %v2101_v2  ;;  %2317 = vmatprep.mubr.msk.f32.mxu1 %vm602_vm0, %v2117_v0 }
  0xbb   : > { %v2800_v3 = vpop.permute.xlu1 %760  ;;  %v649_v4 = vpop.permute.xlu0 %648 }
  0xbc   : > { %vm793_vm15 = vcmp.eq.s32.totalorder %v2800_v3, %v2714_v37  ;;  %vm681_vm1 = vcmp.eq.s32.totalorder %v649_v4, %v2714_v37 }
  0xbd   : > { %v2118_v5 = vsel %vm793_vm15, 1.0, %v2544_v1  ;;  %v2102_v6 = vsel %vm681_vm1, 1.0, %v2544_v1 }
  0xbe   : > { %2290 = vmatmul.mubr.msk.f32.gmra.mxu0 %vm602_vm0, %v2102_v6  ;;  %2318 = vmatmul.mubr.msk.f32.gmra.mxu1 %vm602_vm0, %v2118_v5 }
  0xbf   : > { %v2812_v7 = vpop.permute.xlu1 %763  ;;  %v652_v8 = vpop.permute.xlu0 %651 }
  0xc0   : > { %vm794_vm2 = vcmp.eq.s32.totalorder %v2812_v7, %v2714_v37  ;;  %vm682_vm6 = vcmp.eq.s32.totalorder %v652_v8, %v2714_v37 }
  0xc1   : > { %v2119_v9 = vsel %vm794_vm2, 1.0, %v2544_v1  ;;  %v2103_v10 = vsel %vm682_vm6, 1.0, %v2544_v1 }
  0xc2   : > { %2292 = vmatprep.mubr.msk.f32.mxu0 %vm602_vm0, %v2103_v10  ;;  %2320 = vmatprep.mubr.msk.f32.mxu1 %vm602_vm0, %v2119_v9 }
  0xc3   : > { %v2824_v12 = vpop.permute.xlu1 %766  ;;  %v655_v13 = vpop.permute.xlu0 %654 }
  0xc4   : > { %vm795_vm8 = vcmp.eq.s32.totalorder %v2824_v12, %v2714_v37  ;;  %vm683_vm10 = vcmp.eq.s32.totalorder %v655_v13, %v2714_v37 }
  0xc5   : > { %v2120_v14 = vsel %vm795_vm8, 1.0, %v2544_v1  ;;  %v2104_v15 = vsel %vm683_vm10, 1.0, %v2544_v1 }
  0xc6   : > { %2293 = vmatmul.mubr.msk.f32.gmra.mxu0 %vm602_vm0, %v2104_v15  ;;  %2321 = vmatmul.mubr.msk.f32.gmra.mxu1 %vm602_vm0, %v2120_v14 }
  0xc7   : > { %v770_v16 = vpop.permute.xlu1 %769  ;;  %v658_v17 = vpop.permute.xlu0 %657 }
  0xc8   : > { %vm796_vm12 = vcmp.eq.s32.totalorder %v770_v16, %v2714_v37  ;;  %vm684_vm14 = vcmp.eq.s32.totalorder %v658_v17, %v2714_v37 }
  0xc9   : > { %v2121_v18 = vsel %vm796_vm12, 1.0, %v2544_v1  ;;  %v2105_v19 = vsel %vm684_vm14, 1.0, %v2544_v1 }
  0xca   : > { %2295 = vmatprep.mubr.msk.f32.mxu0 %vm602_vm0, %v2105_v19  ;;  %2323 = vmatprep.mubr.msk.f32.mxu1 %vm602_vm0, %v2121_v18 }
  0xcb   : > { %v773_v20 = vpop.permute.xlu1 %772  ;;  %v661_v21 = vpop.permute.xlu0 %660 }
  0xcc   : > { %vm797_vm1 = vcmp.eq.s32.totalorder %v773_v20, %v2714_v37  ;;  %vm685_vm6 = vcmp.eq.s32.totalorder %v661_v21, %v2714_v37 }
  0xcd   : > { %v2122_v22 = vsel %vm797_vm1, 1.0, %v2544_v1  ;;  %v2106_v23 = vsel %vm685_vm6, 1.0, %v2544_v1 }
  0xce   : > { %2296 = vmatmul.mubr.msk.f32.gmra.mxu0 %vm602_vm0, %v2106_v23  ;;  %2324 = vmatmul.mubr.msk.f32.gmra.mxu1 %vm602_vm0, %v2122_v22 }
  0xcf   : > { %v776_v24 = vpop.permute.xlu1 %775  ;;  %v664_v25 = vpop.permute.xlu0 %663 }
  0xd0   : > { %vm798_vm10 = vcmp.eq.s32.totalorder %v776_v24, %v2714_v37  ;;  %vm686_vm14 = vcmp.eq.s32.totalorder %v664_v25, %v2714_v37 }
  0xd1   : > { %v2123_v26 = vsel %vm798_vm10, 1.0, %v2544_v1  ;;  %v2107_v27 = vsel %vm686_vm14, 1.0, %v2544_v1 }
  0xd2   : > { %2298 = vmatprep.mubr.msk.f32.mxu0 %vm602_vm0, %v2107_v27  ;;  %2326 = vmatprep.mubr.msk.f32.mxu1 %vm602_vm0, %v2123_v26 }
  0xd3   : > { %v779_v28 = vpop.permute.xlu1 %778  ;;  %v667_v29 = vpop.permute.xlu0 %666 }
  0xd4   : > { %vm799_vm6 = vcmp.eq.s32.totalorder %v779_v28, %v2714_v37  ;;  %vm687_vm4 = vcmp.eq.s32.totalorder %v667_v29, %v2714_v37 }
  0xd5   : > { %v2124_v30 = vsel %vm799_vm6, 1.0, %v2544_v1  ;;  %v2108_v31 = vsel %vm687_vm4, 1.0, %v2544_v1 }
  0xd6   : > { %2299 = vmatmul.mubr.msk.f32.gmra.mxu0 %vm602_vm0, %v2108_v31  ;;  %2327 = vmatmul.mubr.msk.f32.gmra.mxu1 %vm602_vm0, %v2124_v30 }
  0xd7   : > { %v782_v32 = vpop.permute.xlu1 %781  ;;  %v670_v33 = vpop.permute.xlu0 %669 }
  0xd8   : > { %vm800_vm14 = vcmp.eq.s32.totalorder %v782_v32, %v2714_v37  ;;  %vm688_vm3 = vcmp.eq.s32.totalorder %v670_v33, %v2714_v37 }
  0xd9   : > { %v2125_v34 = vsel %vm800_vm14, 1.0, %v2544_v1  ;;  %v2109_v35 = vsel %vm688_vm3, 1.0, %v2544_v1  ;;  %vm3169_vm3 = vcmp.eq.s32.totalorder %v2739_v46, %v2714_v37 }
  0xda   : > { %2301 = vmatprep.mubr.msk.f32.mxu0 %vm602_vm0, %v2109_v35  ;;  %2329 = vmatprep.mubr.msk.f32.mxu1 %vm602_vm0, %v2125_v34 }
  0xdb   : > { %v785_v36 = vpop.permute.xlu1 %784  ;;  %v673_v38 = vpop.permute.xlu0 %672 }
  0xdc   : > { %vm801_vm4 = vcmp.eq.s32.totalorder %v785_v36, %v2714_v37  ;;  %vm689_vm5 = vcmp.eq.s32.totalorder %v673_v38, %v2714_v37 }
  0xdd   : > { %v2126_v39 = vsel %vm801_vm4, 1.0, %v2544_v1  ;;  %v2110_v40 = vsel %vm689_vm5, 1.0, %v2544_v1  ;;  %2332 = vmatprep.subr.msk.mxu0 %vm801_vm4, %v2545_v41  ;;  %vm3170_vm5 = vmmov %vm3169_vm3 }
  0xde   : > { %2302 = vmatmul.mubr.msk.f32.gmra.mxu0 %vm602_vm0, %v2110_v40  ;;  %2330 = vmatmul.mubr.msk.f32.gmra.mxu1 %vm602_vm0, %v2126_v39 }
  0xdf   : > { %2333 = vmatpush3.msk.msra.mxu0 %vm801_vm4, %v2545_v41 }
  0xe0   : > { %2334 = vmatprep.subr.msk.mxu0 %vm800_vm14, %v2545_v41 }
  0xe1   : > { %2335 = vmatpush3.msk.msra.mxu0 %vm800_vm14, %v2545_v41 }
  0xe2   : > { %2336 = vmatprep.subr.msk.mxu0 %vm799_vm6, %v2545_v41 }
  0xe3   : > { %2337 = vmatpush3.msk.msra.mxu0 %vm799_vm6, %v2545_v41 }
  0xe4   : > { %2338 = vmatprep.subr.msk.mxu0 %vm798_vm10, %v2545_v41 }
  0xe5   : > { %2339 = vmatpush3.msk.msra.mxu0 %vm798_vm10, %v2545_v41 }
  0xe6   : > { %2340 = vmatprep.subr.msk.mxu0 %vm797_vm1, %v2545_v41 }
  0xe7   : > { %2341 = vmatpush3.msk.msra.mxu0 %vm797_vm1, %v2545_v41 }
  0xe8   : > { %2342 = vmatprep.subr.msk.mxu0 %vm796_vm12, %v2545_v41 }
  0xe9   : > { %2343 = vmatpush3.msk.msra.mxu0 %vm796_vm12, %v2545_v41 }
  0xea   : > { %2344 = vmatprep.subr.msk.mxu0 %vm795_vm8, %v2545_v41 }
  0xeb   : > { %2345 = vmatpush3.msk.msra.mxu0 %vm795_vm8, %v2545_v41  ;;  %vm1623_vm8 = vcmask 1043456  }
  0xec   : > { %2346 = vmatprep.subr.msk.mxu0 %vm794_vm2, %v2545_v41 }
  0xed   : > { %2347 = vmatpush3.msk.msra.mxu0 %vm794_vm2, %v2545_v41  ;;  %vm604_vm2 = vcmask 125952  }
  0xee   : > { %2348 = vmatprep.subr.msk.mxu0 %vm793_vm15, %v2545_v41  ;;  %605 = vst.msk [vmem:[#allocation2 + $0x8] sm:$0xf] %vm604_vm2, %v2544_v1 }
  0xef   : > { %2349 = vmatpush3.msk.msra.mxu0 %vm793_vm15, %v2545_v41  ;;  %vm1284_vm15 = vcmask 97280  }
  0xf0   : > { %2350 = vmatprep.subr.msk.mxu0 %vm792_vm13, %v2545_v41 }
  0xf1   : > { %2351 = vmatpush3.msk.msra.mxu0 %vm792_vm13, %v2545_v41  ;;  %vm3173_vm13 = vcmp.eq.s32.totalorder %v2723_v43, %v2714_v37 }
  0xf2   : > { %2352 = vmatprep.subr.msk.mxu0 %vm791_vm11, %v2545_v41 }
  0xf3   : > { %2353 = vmatpush3.msk.msra.mxu0 %vm791_vm11, %v2545_v41  ;;  %vm3171_vm11 = vcmp.eq.s32.totalorder %v2721_v42, %v2714_v37  ;;  %v2972_v42 = vld [vmem:[%s572_s28] ss:$0 sm:$0xff] }
  0xf4   : > { %2354 = vmatprep.subr.msk.mxu0 %vm790_vm9, %v2545_v41 }
  0xf5   : > { %2355 = vmatpush3.msk.msra.mxu0 %vm790_vm9, %v2545_v41  ;;  %vm3172_vm9 = vmmov %vm3171_vm11 }
  0xf6   : > { %2356 = vmatprep.subr.msk.mxu0 %vm789_vm7, %v2545_v41 }
  0xf7   : > { %2357 = vmatpush3.msk.msra.mxu0 %vm789_vm7, %v2545_v41  ;;  %vm3174_vm7 = vmmov %vm3173_vm13 }
  0xf8   : > { %2358 = vmatprep.subr.msk.mxu0 %vm3169_vm3, %v2545_v41 }
  0xf9   : > { %2359 = vmatpush3.msk.msra.mxu0 %vm3170_vm5, %v2545_v41 }
  0xfa   : > { %2360 = vmatprep.subr.msk.mxu0 %vm3171_vm11, %v2545_v41 }
  0xfb   : > { %2361 = vmatpush3.msk.msra.mxu0 %vm3172_vm9, %v2545_v41 }
  0xfc   : > { %2362 = vmatprep.subr.msk.mxu0 %vm3173_vm13, %v2545_v41 }
  0xfd   : > { %2363 = vmatpush3.msk.msra.mxu0 %vm3174_vm7, %v2545_v41 }
 0x163   : > { %v2970_v44 = vpop.f32.mrf.mxu0 }
 0x164   : > { %v1253_v37 = vmul.f32 %v2970_v44, %v2972_v42 }
 0x165   : > { %v2976_v46 = vpop.f32.mrf.mxu0 }
 0x166   : > { %v1252_v49 = vmul.f32 %v2972_v42, %v2976_v46 }
 0x167   : > { %v2310_v47 = vpop.f32.mrf.mxu1 }
 0x168   : > { %v1230_v43 = vmul.f32 %v2310_v47, %v2974_v45 }
 0x169   : > { %v1142_v48 = vpop.f32.mrf.mxu1 }
 0x16a   : > { %v1229_v50 = vmul.f32 %v2974_v45, %v1142_v48  ;;  %v1269_v51 = vadd.f32 %v1253_v37, %v1230_v43 }
 0x16c   : > { %v1288_v52 = vsel %vm1284_vm15, %v1269_v51, 0.0  ;;  %v1268_v53 = vadd.f32 %v1252_v49, %v1229_v50 }
 0x16d   : > { %1289 = vadd.xlane.f32.xlu1 %v1288_v52 }
 0x16e   : > { %v2985_v54 = vpop.f32.mrf.mxu0  ;;  %v2313_v55 = vpop.f32.mrf.mxu1  ;;  %v1285_v56 = vsel %vm1284_vm15, %v1268_v53, 0.0 }
 0x16f   : > { %1286 = vadd.xlane.f32.xlu0 %v1285_v56  ;;  %v1255_v59 = vmul.f32 %v2985_v54, %v2972_v42  ;;  %v1232_v60 = vmul.f32 %v2313_v55, %v2974_v45 }
 0x170   : > { %v2988_v57 = vpop.f32.mrf.mxu0  ;;  %v1152_v58 = vpop.f32.mrf.mxu1 }
 0x171   : > { %v1254_v61 = vmul.f32 %v2972_v42, %v2988_v57  ;;  %v1231_v62 = vmul.f32 %v2974_v45, %v1152_v58  ;;  %v1271_v2 = vadd.f32 %v1255_v59, %v1232_v60 }
 0x173   : > { %v1270_v63 = vadd.f32 %v1254_v61, %v1231_v62  ;;  %v1294_v12 = vsel %vm1284_vm15, %v1271_v2, 0.0 }
 0x175   : > { %v1291_v0 = vsel %vm1284_vm15, %v1270_v63, 0.0 }
 0x176   : > { %v2316_v3 = vpop.f32.mrf.mxu1  ;;  %1292 = vadd.xlane.f32.xlu0 %v1291_v0  ;;  %v2997_v4 = vpop.f32.mrf.mxu0 }
 0x177   : > { %v1234_v5 = vmul.f32 %v2316_v3, %v2974_v45  ;;  %v1257_v6 = vmul.f32 %v2997_v4, %v2972_v42 }
 0x178   : > { %v3002_v7 = vpop.f32.mrf.mxu0  ;;  %v1162_v8 = vpop.f32.mrf.mxu1 }
 0x179   : > { %v1256_v9 = vmul.f32 %v2972_v42, %v3002_v7  ;;  %v1233_v10 = vmul.f32 %v2974_v45, %v1162_v8  ;;  %v1273_v13 = vadd.f32 %v1257_v6, %v1234_v5 }
 0x17a   : > { %1295 = vadd.xlane.f32.xlu0 %v1294_v12 }
 0x17b   : > { %v1272_v14 = vadd.f32 %v1256_v9, %v1233_v10  ;;  %v1300_v15 = vsel %vm1284_vm15, %v1273_v13, 0.0 }
 0x17d   : > { %v1297_v16 = vsel %vm1284_vm15, %v1272_v14, 0.0 }
 0x17e   : > { %v2319_v17 = vpop.f32.mrf.mxu1  ;;  %1301 = vadd.xlane.f32.xlu0 %v1300_v15  ;;  %1298 = vadd.xlane.f32.xlu1 %v1297_v16  ;;  %v3010_v18 = vpop.f32.mrf.mxu0 }
 0x17f   : > { %v1236_v19 = vmul.f32 %v2319_v17, %v2974_v45  ;;  %v1259_v20 = vmul.f32 %v3010_v18, %v2972_v42 }
 0x180   : > { %v3015_v21 = vpop.f32.mrf.mxu0  ;;  %v1172_v22 = vpop.f32.mrf.mxu1 }
 0x181   : > { %v1258_v23 = vmul.f32 %v2972_v42, %v3015_v21  ;;  %v1235_v24 = vmul.f32 %v2974_v45, %v1172_v22  ;;  %v1275_v25 = vadd.f32 %v1259_v20, %v1236_v19 }
 0x183   : > { %v1306_v26 = vsel %vm1284_vm15, %v1275_v25, 0.0  ;;  %v1274_v27 = vadd.f32 %v1258_v23, %v1235_v24  ;;  %v3071_v25 = vstv %s1221_s14 }
 0x184   : > { %1307 = vadd.xlane.f32.xlu0 %v1306_v26 }
 0x185   : > { %v1303_v28 = vsel %vm1284_vm15, %v1274_v27, 0.0 }
 0x186   : > { %v2322_v29 = vpop.f32.mrf.mxu1  ;;  %1304 = vadd.xlane.f32.xlu1 %v1303_v28  ;;  %v3022_v30 = vpop.f32.mrf.mxu0 }
 0x187   : > { %v1238_v31 = vmul.f32 %v2322_v29, %v2974_v45  ;;  %v1261_v32 = vmul.f32 %v3022_v30, %v2972_v42 }
 0x188   : > { %v3027_v33 = vpop.f32.mrf.mxu0  ;;  %v1182_v34 = vpop.f32.mrf.mxu1 }
 0x189   : > { %v1260_v35 = vmul.f32 %v2972_v42, %v3027_v33  ;;  %v1237_v36 = vmul.f32 %v2974_v45, %v1182_v34  ;;  %v1277_v38 = vadd.f32 %v1261_v32, %v1238_v31 }
 0x18b   : > { %v1312_v39 = vsel %vm1284_vm15, %v1277_v38, 0.0  ;;  %v1276_v40 = vadd.f32 %v1260_v35, %v1237_v36 }
 0x18c   : > { %1313 = vadd.xlane.f32.xlu0 %v1312_v39 }
 0x18d   : > { %v1309_v41 = vsel %vm1284_vm15, %v1276_v40, 0.0 }
 0x18e   : > { %v2325_v47 = vpop.f32.mrf.mxu1  ;;  %1310 = vadd.xlane.f32.xlu1 %v1309_v41  ;;  %v3034_v37 = vpop.f32.mrf.mxu0 }
 0x18f   : > { %v1240_v43 = vmul.f32 %v2325_v47, %v2974_v45  ;;  %v1263_v48 = vmul.f32 %v3034_v37, %v2972_v42 }
 0x190   : > { %v3039_v49 = vpop.f32.mrf.mxu0  ;;  %v1192_v50 = vpop.f32.mrf.mxu1 }
 0x191   : > { %v1262_v51 = vmul.f32 %v2972_v42, %v3039_v49  ;;  %v1239_v52 = vmul.f32 %v2974_v45, %v1192_v50  ;;  %v1279_v53 = vadd.f32 %v1263_v48, %v1240_v43 }
 0x193   : > { %v1318_v55 = vsel %vm1284_vm15, %v1279_v53, 0.0  ;;  %v1278_v56 = vadd.f32 %v1262_v51, %v1239_v52 }
 0x194   : > { %1319 = vadd.xlane.f32.xlu0 %v1318_v55 }
 0x195   : > { %v1315_v58 = vsel %vm1284_vm15, %v1278_v56, 0.0 }
 0x196   : > { %v2328_v59 = vpop.f32.mrf.mxu1  ;;  %1316 = vadd.xlane.f32.xlu1 %v1315_v58  ;;  %v3046_v60 = vpop.f32.mrf.mxu0 }
 0x197   : > { %v1242_v61 = vmul.f32 %v2328_v59, %v2974_v45  ;;  %v1265_v62 = vmul.f32 %v3046_v60, %v2972_v42 }
 0x198   : > { %v3051_v63 = vpop.f32.mrf.mxu0  ;;  %v1202_v0 = vpop.f32.mrf.mxu1 }
 0x199   : > { %v1264_v2 = vmul.f32 %v2972_v42, %v3051_v63  ;;  %v1241_v3 = vmul.f32 %v2974_v45, %v1202_v0  ;;  %v1281_v5 = vadd.f32 %v1265_v62, %v1242_v61 }
 0x19b   : > { %v1324_v6 = vsel %vm1284_vm15, %v1281_v5, 0.0  ;;  %v1280_v8 = vadd.f32 %v1264_v2, %v1241_v3 }
 0x19c   : > { %1325 = vadd.xlane.f32.xlu0 %v1324_v6 }
 0x19d   : > { %v1321_v9 = vsel %vm1284_vm15, %v1280_v8, 0.0 }
 0x19e   : > { %v2331_v10 = vpop.f32.mrf.mxu1  ;;  %1322 = vadd.xlane.f32.xlu1 %v1321_v9  ;;  %v3058_v12 = vpop.f32.mrf.mxu0 }
 0x19f   : > { %v1244_v13 = vmul.f32 %v2331_v10, %v2974_v45  ;;  %v1267_v14 = vmul.f32 %v3058_v12, %v2972_v42 }
 0x1a0   : > { %v3063_v15 = vpop.f32.mrf.mxu0  ;;  %v1212_v16 = vpop.f32.mrf.mxu1 }
 0x1a1   : > { %v1266_v17 = vmul.f32 %v2972_v42, %v3063_v15  ;;  %v1243_v19 = vmul.f32 %v2974_v45, %v1212_v16  ;;  %v1283_v20 = vadd.f32 %v1267_v14, %v1244_v13 }
 0x1a3   : > { %v1330_v22 = vsel %vm1284_vm15, %v1283_v20, 0.0  ;;  %v1282_v23 = vadd.f32 %v1266_v17, %v1243_v19 }
 0x1a4   : > { %1331 = vadd.xlane.f32.xlu0 %v1330_v22 }
 0x1a5   : > { %v1327_v24 = vsel %vm1284_vm15, %v1282_v23, 0.0 }
 0x1a6   : > { %1328 = vadd.xlane.f32.xlu1 %v1327_v24 }
 0x1f6   : > { %v1290_v26 = vpop.xlane.xlu1 %1289 }
 0x1f7   : > { %v1335_v27 = vadd.f32 %v3071_v25, %v1290_v26 }
 0x1f8   : > { %v1287_v28 = vpop.xlane.xlu0 %1286 }
 0x1f9   : > { %v2162_v29 = vmul.f32 -1.442695, %v1335_v27  ;;  %v1334_v42 = vadd.f32 %v3071_v25, %v1287_v28 }
 0x1fb   : > { %2426 = vpow2.f32 %v2162_v29  ;;  %v2161_v45 = vmul.f32 -1.442695, %v1334_v42 }
 0x1fd   : > { %2428 = vpow2.f32 %v2161_v45 }
 0x1ff   : > { %v1293_v31 = vpop.xlane.xlu0 %1292 }
 0x200   : > { %v1336_v32 = vadd.f32 %v3071_v25, %v1293_v31 }
 0x202   : > { %v2163_v34 = vmul.f32 -1.442695, %v1336_v32 }
 0x203   : > { %v1296_v35 = vpop.xlane.xlu0 %1295 }
 0x204   : > { %2430 = vpow2.f32 %v2163_v34  ;;  %v1337_v36 = vadd.f32 %v3071_v25, %v1296_v35 }
 0x206   : > { %v2164_v38 = vmul.f32 -1.442695, %v1337_v36 }
 0x207   : > { %v1302_v39 = vpop.xlane.xlu0 %1301  ;;  %v1299_v40 = vpop.xlane.xlu1 %1298 }
 0x208   : > { %v2427_v41 = vpop.eup %2426  ;;  %2432 = vpow2.f32 %v2164_v38  ;;  %v1339_v47 = vadd.f32 %v3071_v25, %v1302_v39  ;;  %v1338_v43 = vadd.f32 %v3071_v25, %v1299_v40 }
 0x209   : > { %v1399_v52 = vadd.f32 1.0, %v2427_v41 }
 0x20a   : > { %v2429_v48 = vpop.eup %2428  ;;  %v2166_v50 = vmul.f32 -1.442695, %v1339_v47  ;;  %v2165_v51 = vmul.f32 -1.442695, %v1338_v43 }
 0x20b   : > { %v1398_v53 = vadd.f32 1.0, %v2429_v48 }
 0x20c   : > { %2434 = vpow2.f32 %v2166_v50 }
 0x20d   : > { %2436 = vrcp.f32 %v1398_v53  ;;  %v1308_v55 = vpop.xlane.xlu0 %1307 }
 0x20e   : > { %2438 = vpow2.f32 %v2165_v51  ;;  %v1341_v56 = vadd.f32 %v3071_v25, %v1308_v55 }
 0x20f   : > { %2440 = vrcp.f32 %v1399_v52  ;;  %v1305_v58 = vpop.xlane.xlu1 %1304 }
 0x210   : > { %v2168_v59 = vmul.f32 -1.442695, %v1341_v56  ;;  %v1340_v61 = vadd.f32 %v3071_v25, %v1305_v58 }
 0x211   : > { %v2431_v62 = vpop.eup %2430 }
 0x212   : > { %v1400_v0 = vadd.f32 1.0, %v2431_v62  ;;  %v2167_v2 = vmul.f32 -1.442695, %v1340_v61  ;;  %2442 = vpow2.f32 %v2168_v59 }
 0x214   : > { %2444 = vrcp.f32 %v1400_v0 }
 0x215   : > { %v2433_v3 = vpop.eup %2432  ;;  %2446 = vpow2.f32 %v2167_v2  ;;  %v1314_v5 = vpop.xlane.xlu0 %1313 }
 0x216   : > { %v1401_v6 = vadd.f32 1.0, %v2433_v3  ;;  %v1343_v8 = vadd.f32 %v3071_v25, %v1314_v5 }
 0x217   : > { %v1311_v9 = vpop.xlane.xlu1 %1310 }
 0x218   : > { %2448 = vrcp.f32 %v1401_v6  ;;  %v2170_v10 = vmul.f32 -1.442695, %v1343_v8  ;;  %v1342_v13 = vadd.f32 %v3071_v25, %v1311_v9 }
 0x219   : > { %v2435_v14 = vpop.eup %2434 }
 0x21a   : > { %v2437_v16 = vpop.eup %2436  ;;  %v2169_v17 = vmul.f32 -1.442695, %v1342_v13  ;;  %v1403_v23 = vadd.f32 1.0, %v2435_v14  ;;  %2450 = vpow2.f32 %v2170_v10 }
 0x21b   : > { %v2439_v19 = vpop.eup %2438  ;;  %v1446_v20 = vmul.f32 %v2437_v16, %v2976_v46 }
 0x21c   : > { %v2441_v22 = vpop.eup %2440  ;;  %v1402_v24 = vadd.f32 1.0, %v2439_v19  ;;  %2452 = vpow2.f32 %v2169_v17 }
 0x21d   : > { %v1320_v26 = vpop.xlane.xlu0 %1319  ;;  %1464 = vxpose.xlu1.b32.start [1/16] (narrow) %v1446_v20, 16  ;;  %v1447_v29 = vmul.f32 %v2441_v22, %v2970_v44 }
 0x21e   : > { %2454 = vrcp.f32 %v1402_v24  ;;  %v1345_v27 = vadd.f32 %v3071_v25, %v1320_v26 }
 0x21f   : > { %v1317_v28 = vpop.xlane.xlu1 %1316  ;;  %v2443_v42 = vpop.eup %2442  ;;  %2456 = vrcp.f32 %v1403_v23 }
 0x220   : > { %v2172_v45 = vmul.f32 -1.442695, %v1345_v27  ;;  %v1344_v31 = vadd.f32 %v3071_v25, %v1317_v28  ;;  %v1405_v38 = vadd.f32 1.0, %v2443_v42 }
 0x221   : > { %v2445_v46 = vpop.eup %2444  ;;  %1465 = vxpose.xlu1.b32.cont [2/16] (narrow) %v1447_v29, 16 }
 0x222   : > { %v2447_v32 = vpop.eup %2446  ;;  %v2171_v34 = vmul.f32 -1.442695, %v1344_v31  ;;  %v1448_v35 = vmul.f32 %v2445_v46, %v2988_v57  ;;  %2458 = vpow2.f32 %v2172_v45 }
 0x223   : > { %v1404_v36 = vadd.f32 1.0, %v2447_v32 }
 0x224   : > { %2460 = vpow2.f32 %v2171_v34 }
 0x225   : > { %v2449_v44 = vpop.eup %2448  ;;  %2462 = vrcp.f32 %v1404_v36  ;;  %v1326_v39 = vpop.xlane.xlu0 %1325  ;;  %1466 = vxpose.xlu1.b32.cont [3/16] (narrow) %v1448_v35, 16  ;;  %v1462_v35 = vld [vmem:[#allocation2] sm:$0xff] }
 0x226   : > { %v1347_v40 = vadd.f32 %v3071_v25, %v1326_v39  ;;  %v1449_v41 = vmul.f32 %v2449_v44, %v2985_v54  ;;  %2464 = vrcp.f32 %v1405_v38  ;;  %v1581_v39 = vld [vmem:[%s577_s24] sm:$0xff] }
 0x227   : > { %v1323_v47 = vpop.xlane.xlu1 %1322  ;;  %v2451_v48 = vpop.eup %2450 }
 0x228   : > { %v2174_v1 = vmul.f32 -1.442695, %v1347_v40  ;;  %v1346_v43 = vadd.f32 %v3071_v25, %v1323_v47  ;;  %v1407_v53 = vadd.f32 1.0, %v2451_v48  ;;  %v1797_v48 = vld [vmem:[%s589_s30] sm:$0xff] }
 0x229   : > { %1467 = vxpose.xlu1.b32.cont [4/16] (narrow) %v1449_v41, 16  ;;  %v2453_v57 = vpop.eup %2452  ;;  %v2498_v41 = vld [vmem:[%s2678_s25 + $0x8] sm:$0xff] }
 0x22a   : > { %v2173_v50 = vmul.f32 -1.442695, %v1346_v43  ;;  %v1406_v52 = vadd.f32 1.0, %v2453_v57  ;;  %2466 = vpow2.f32 %v2174_v1 }
 0x22b   : > { %v2455_v51 = vpop.eup %2454 }
 0x22c   : > { %2468 = vpow2.f32 %v2173_v50  ;;  %v1450_v55 = vmul.f32 %v2455_v51, %v3002_v7  ;;  %v2457_v56 = vpop.eup %2456 }
 0x22d   : > { %2470 = vrcp.f32 %v1406_v52  ;;  %v1332_v58 = vpop.xlane.xlu0 %1331  ;;  %v1451_v2 = vmul.f32 %v2457_v56, %v2997_v4  ;;  %v2199_v52 = vld [vmem:[%s585_s13] ss:$0 sm:$0xff] }
 0x22e   : > { %v1349_v54 = vadd.f32 %v3071_v25, %v1332_v58  ;;  %1468 = vxpose.xlu1.b32.cont [5/16] (narrow) %v1450_v55, 16  ;;  %2472 = vrcp.f32 %v1407_v53 }
 0x22f   : > { %v1329_v59 = vpop.xlane.xlu1 %1328  ;;  %v2459_v61 = vpop.eup %2458 }
 0x230   : > { %v2176_v62 = vmul.f32 -1.442695, %v1349_v54  ;;  %v1348_v0 = vadd.f32 %v3071_v25, %v1329_v59  ;;  %v1409_v9 = vadd.f32 1.0, %v2459_v61 }
 0x231   : > { %v2461_v3 = vpop.eup %2460 }
 0x232   : > { %v2463_v5 = vpop.eup %2462  ;;  %v1408_v6 = vadd.f32 1.0, %v2461_v3  ;;  %v2175_v8 = vmul.f32 -1.442695, %v1348_v0  ;;  %1469 = vxpose.xlu1.b32.cont [6/16] (narrow) %v1451_v2, 16  ;;  %2474 = vpow2.f32 %v2176_v62  ;;  %v2200_v62 = vld [vmem:[%s592_s15] ss:$0 sm:$0xff] }
 0x233   : > { %v1452_v7 = vmul.f32 %v2463_v5, %v3015_v21  ;;  %v2465_v10 = vpop.eup %2464 }
 0x234   : > { %2476 = vrcp.f32 %v1408_v6  ;;  %v1453_v14 = vmul.f32 %v2465_v10, %v3010_v18 }
 0x235   : > { %2478 = vpow2.f32 %v2175_v8 }
 0x236   : > { %1470 = vxpose.xlu1.b32.cont [7/16] (narrow) %v1452_v7, 16  ;;  %2480 = vrcp.f32 %v1409_v9 }
 0x237   : > { %v2467_v13 = vpop.eup %2466 }
 0x238   : > { %v1411_v19 = vadd.f32 1.0, %v2467_v13 }
 0x239   : > { %v2469_v25 = vpop.eup %2468 }
 0x23a   : > { %v2471_v16 = vpop.eup %2470  ;;  %v1410_v4 = vadd.f32 1.0, %v2469_v25  ;;  %1471 = vxpose.xlu1.b32.cont [8/16] (narrow) %v1453_v14, 16 }
 0x23b   : > { %v1454_v17 = vmul.f32 %v2471_v16, %v3027_v33  ;;  %v2473_v20 = vpop.eup %2472 }
 0x23c   : > { %2482 = vrcp.f32 %v1410_v4  ;;  %v1455_v22 = vmul.f32 %v2473_v20, %v3022_v30 }
 0x23d   : > { %2484 = vrcp.f32 %v1411_v19 }
 0x23e   : > { %1472 = vxpose.xlu1.b32.cont [9/16] (narrow) %v1454_v17, 16 }
 0x23f   : > { %v2475_v21 = vpop.eup %2474 }
 0x240   : > { %v1413_v27 = vadd.f32 1.0, %v2475_v21 }
 0x241   : > { %v2477_v23 = vpop.eup %2476 }
 0x242   : > { %v2479_v24 = vpop.eup %2478  ;;  %1473 = vxpose.xlu1.b32.cont [10/16] (narrow) %v1455_v22, 16  ;;  %v1456_v26 = vmul.f32 %v2477_v23, %v3039_v49 }
 0x243   : > { %v1412_v18 = vadd.f32 1.0, %v2479_v24  ;;  %v2481_v28 = vpop.eup %2480 }
 0x244   : > { %v1457_v33 = vmul.f32 %v2481_v28, %v3034_v37 }
 0x245   : > { %2486 = vrcp.f32 %v1412_v18 }
 0x246   : > { %1474 = vxpose.xlu1.b32.cont [11/16] (narrow) %v1456_v26, 16  ;;  %2488 = vrcp.f32 %v1413_v27 }
 0x249   : > { %v2483_v29 = vpop.eup %2482 }
 0x24a   : > { %1475 = vxpose.xlu1.b32.cont [12/16] (narrow) %v1457_v33, 16  ;;  %v1458_v42 = vmul.f32 %v2483_v29, %v3051_v63  ;;  %v2485_v45 = vpop.eup %2484  ;;  %v1583_v63 = vld [vmem:[%s582_s16] sm:$0xff] }
 0x24b   : > { %v1459_v30 = vmul.f32 %v2485_v45, %v3046_v60  ;;  %v1584_v60 = vld [vmem:[%s582_s16 + $0x8] sm:$0xf] }
 0x24c   : > { %2367 = vmatprep.subr.msk.mxu1 %vm1623_vm8, %v1584_v60 }
 0x24d   : > { %2368 = vmatpush3.msk.msra.mxu1 %vm1623_vm8, %v1584_v60 }
 0x24e   : > { %1476 = vxpose.xlu1.b32.cont [13/16] (narrow) %v1458_v42, 16  ;;  %2369 = vmatprep.subr.mxu1 %v1583_v63 }
 0x24f   : > { %2370 = vmatpush3.msra.mxu1 %v1583_v63 }
 0x250   : > { %2381 = vmatprep.subr.mxu1 %v1797_v48 }
 0x252   : > { %v2487_v31 = vpop.eup %2486  ;;  %1477 = vxpose.xlu1.b32.cont [14/16] (narrow) %v1459_v30, 16 }
 0x253   : > { %v1460_v49 = vmul.f32 %v2487_v31, %v3063_v15  ;;  %v2489_v46 = vpop.eup %2488 }
 0x254   : > { %v1461_v32 = vmul.f32 %v2489_v46, %v3058_v12  ;;  %v1582_v12 = vld [vmem:[%s577_s24 + $0x8] sm:$0xf] }
 0x255   : > { %2374 = vmatprep.subr.msk.mxu0 %vm1623_vm8, %v1582_v12 }
 0x256   : > { %1478 = vxpose.xlu1.b32.cont [15/16] (narrow) %v1460_v49, 16 }
 0x25a   : > { %1479 = vxpose.xlu1.b32.end [16/16] (narrow) %v1461_v32, 16 }
 0x29a   : > { %v1480_v37 = vpop.trf.xlu1 }
 0x29b   : > { %2364 = vmatprep.mubr.f32.mxu0 %v1480_v37 }
 0x29e   : > { %v1481_v34 = vpop.trf.xlu1 }
 0x29f   : > { %2365 = vmatmul.mubr.f32.vlgmr.msra.gmra.mxu0 %v1481_v34 }
 0x2a0   : > { %2378 = vmatprep.mubr.msk.f32.mxu0 %vm1284_vm15, %v2684_v11  ;;  %2375 = vmatpush3.msk.msra.mxu0 %vm1623_vm8, %v1582_v12  ;;  %v1463_v11 = vld [vmem:[#allocation2 + $0x8] sm:$0xf] }
 0x2a1   : > { %2376 = vmatprep.subr.mxu0 %v1581_v39 }
 0x2a2   : > { %2377 = vmatpush3.msra.mxu0 %v1581_v39 }
 0x2a3   : > { %2379 = vmatmul.mubr.msk.f32.vlgmr.msra.gmra.mxu0 %vm1284_vm15, %v2498_v41 }
 0x35f   : > { %v2366_v15 = vpop.f32.mrf.mxu0 }
 0x360   : > { %v1572_v36 = vadd.f32 %v2366_v15, %v1463_v11 }
 0x361   : > { %v1562_v38 = vpop.f32.mrf.mxu0 }
 0x362   : > { %1575 = vst.msk [vmem:[#allocation2 + $0x8] sm:$0xf] %vm604_vm2, %v1572_v36  ;;  %v1571_v44 = vadd.f32 %v1562_v38, %v1462_v35 }
 0x363   : > { %v2380_v57 = vpop.f32.mrf.mxu0 }
 0x364   : > { %1573 = vst.msk [vmem:[#allocation2] sm:$0xff] %vm602_vm0, %v1571_v44  ;;  %vm1805_vm0 = vcmask 64512  }
 0x365   : > { %v1777_v53 = vpop.f32.mrf.mxu0 }
 0x369   : > { %v1580_v47 = vld [vmem:[#allocation2 + $0x8] sm:$0xf] }
 0x36b   : > { %v1579_v40 = vld [vmem:[#allocation2] sm:$0xff] }
 0x36c   : > { %1585 = vxpose.xlu0.b32.start [1/2] (short) (narrow) %v1579_v40, 16 }
 0x370   : > { %1586 = vxpose.xlu0.b32.end [2/2] (short) (narrow) %v1580_v47, 16 }
 0x3e8   : > { %v1601_v1 = vpop.trf.xlu0 }
 0x3e9   : > { %2371 = vmatprep.mubr.msk.f32.mxu1 %vm1284_vm15, %v1601_v1 }
 0x3ec   : > { %v1602_v43 = vpop.trf.xlu0 }
 0x3ed   : > { %2372 = vmatmul.mubr.msk.f32.vlgmr.msra.gmra.mxu1 %vm1284_vm15, %v1602_v43 }
 0x3ee   : > { %2382 = vmatpush3.msra.mxu1 %v1797_v48 }
 0x4ad   : > { %v2373_v50 = vpop.f32.mrf.mxu1 }
 0x4ae   : > { %v1783_v51 = vadd.f32 %v2380_v57, %v2373_v50 }
 0x4af   : > { %v1693_v55 = vpop.f32.mrf.mxu1 }
 0x4b0   : > { %v1778_v56 = vadd.f32 %v1777_v53, %v1693_v55  ;;  %v1794_v58 = vadd.f32 %v2199_v52, %v1783_v51 }
 0x4b2   : > { %v1793_v54 = vadd.f32 %v2199_v52, %v1778_v56 }
 0x4b4   : > { %2490 = vtanh.f32 %v1793_v54 }
 0x4b5   : > { %2492 = vtanh.f32 %v1794_v58 }
 0x4c1   : > { %v2491_v59 = vpop.eup %2490 }
 0x4c2   : > { %v2493_v61 = vpop.eup %2492  ;;  %2383 = vmatprep.mubr.msk.f32.mxu1 %vm1805_vm0, %v2491_v59 }
 0x4c3   : > { %2384 = vmatmul.mubr.msk.f32.vlgmr.msra.gmra.mxu1 %vm1805_vm0, %v2493_v61 }
 0x583   : > { %v2385_v0 = vpop.f32.mrf.mxu1 }
 0x584   : > { %v1884_v2 = vadd.f32 %v2385_v0, %v2200_v62 }
 0x585   : > { %v1878_v3 = vpop.f32.mrf.mxu1 }
 0x586   : > { %2494 = vtanh.f32 %v1884_v2  ;;  %v1879_v5 = vadd.f32 %v2200_v62, %v1878_v3 }
 0x588   : > { %2496 = vtanh.f32 %v1879_v5 }
 0x593   : > { %v2495_v6 = vpop.eup %2494 }
 0x594   : > { %1890 = vst.msk [vmem:[%s597_s23 + $0x8] sm:$0xff] %vm1805_vm0, %v2495_v6 }
 0x595   : > { %v2497_v8 = vpop.eup %2496 }
 0x596   : > { %1889 = vst.msk [vmem:[%s597_s23] sm:$0xff] %vm1805_vm0, %v2497_v8 }
 0x597 PF: > { %s22_s19 = sadd.s32 1, %s2540_s19   ;;  %s3175_s17 = smov %s2536_s18 }
 0x598   : > { %p19_p2 = scmp.ge.s32.totalorder %s22_s19, 5   ;;  %s3176_s18 = smov %s3178_s21 }
 0x59a   :  { %21 = sbr.rel (!%p19_p2) target bundleno = 2 (0x2), region = 134 }
 0x59f   :  { %1912 = vsyncpa [#allocation4], 1 }
 0x5a0   :  { %1914 = vsyncpa [#allocation4 + $0x1], 1 }

</bundles_post_ra>
